<compile_context>
chip_gen: v5e
topology: v5e:2x2
jax: 0.10.0
libtpu: 0.0.40
codegen_flags: <defaults>
</compile_context>

<pallas_src>
import jax
import jax.numpy as jnp
from jax.experimental import pallas as pl
from jax.experimental.pallas import tpu as pltpu


def _affine_kernel_resident(gb_ref, x_ref, o_ref):
    # gamma/beta are VMEM-resident (copied once); slice this tile's rows.
    rc = x_ref.shape[0]
    start = pl.multiple_of(pl.program_id(0) * rc, rc)
    gb = gb_ref[pl.ds(start, rc), :]          # (rc, 2) — in bounds: gb padded to grid*rc rows
    g = gb[:, 0:1]
    b = gb[:, 1:2]
    o_ref[...] = (g * x_ref[...] + b).astype(o_ref.dtype)


def _affine_kernel_tiled(gb_ref, x_ref, o_ref):
    # gamma/beta arrive as a single (rc, 2) tile per step.
    g = gb_ref[:, 0:1]
    b = gb_ref[:, 1:2]
    o_ref[...] = (g * x_ref[...] + b).astype(o_ref.dtype)


def _pick_row_tile(R, S, itemsize, target_tile_bytes=4 << 20):
    """Rows per block (rc) and grid size.

    * rc is a multiple of the dtype's sublane packing (8 f32, 16 bf16, 32 int8)
      so tiles stay dense and stores unmasked.
    * target_tile_bytes is the x-tile size; total live VMEM is ~4x that
      (x in + y out, each double-buffered) plus the small gamma/beta buffer —
      4 MiB keeps that under the 32 MiB scoped limit on every generation.
    * rc is capped at R//2 (pack-rounded) when R allows it, so there are >= 2
      row tiles and both v7x TensorCores get work.
    * grid = cdiv(R, rc): no divisibility requirement, no full-R fallback.
    """
    pack = {1: 32, 2: 16}.get(itemsize, 8)
    max_rows = max(pack, (target_tile_bytes // max(1, S * itemsize)) // pack * pack)
    half = (R // 2) // pack * pack
    if half >= pack:
        max_rows = min(max_rows, half)
    if max_rows >= R:
        return R, 1                           # single full-extent block (always legal)
    return max_rows, pl.cdiv(R, max_rows)


def affine_skip_part(x, gamma, beta, skip1, skip2):
    """y = (gamma + skip1*gamma) * x + (beta + skip2*beta), per channel.

    x: (N, C, H, W); gamma/beta/skip1/skip2: (1, C, 1, 1).
    """
    N, C, H, W = x.shape
    R, S = N * C, H * W
    itemsize = jnp.dtype(x.dtype).itemsize

    # Fold the skip math host-side (C-length ops) in the same order as the
    # PyTorch forward: gamma = gamma + skip1*gamma, beta = beta + skip2*beta.
    g = gamma.reshape(C)
    b = beta.reshape(C)
    g_eff = g + skip1.reshape(C) * g
    b_eff = b + skip2.reshape(C) * b

    rc, grid_r = _pick_row_tile(R, S, itemsize)
    R_pad = rc * grid_r

    # Per-row (channel) scale/offset for the flattened (N*C, H*W) view:
    # row n*C + c uses channel c. Packed into one (R_pad, 2) array.
    # (Cast to x.dtype: kernel math stays in the activation dtype; with bf16
    # activations + f32 params this rounds the params — acceptable here and
    # mirrored by computing the reference in the same dtypes in this script.)
    g_rows = jnp.tile(g_eff.astype(x.dtype), N)
    b_rows = jnp.tile(b_eff.astype(x.dtype), N)
    gb = jnp.stack([g_rows, b_rows], axis=-1)          # (R, 2)
    if R_pad != R:
        gb = jnp.pad(gb, ((0, R_pad - R), (0, 0)))     # padded rows are never read back

    x2 = x.reshape(R, S)
    row_spec = pl.BlockSpec((rc, S), lambda i: (i, 0))  # lane-dense full H*W

    # gamma/beta: VMEM-resident (one DMA total) when the lane-padded footprint
    # is small; otherwise one small (rc, 2) DMA per step.
    resident_bytes = R_pad * 128 * itemsize            # (R_pad, 2) pads lanes to 128
    if resident_bytes <= (2 << 20):
        gb_spec = pl.BlockSpec((R_pad, 2), lambda i: (0, 0))  # constant index -> stays resident
        kernel = _affine_kernel_resident
    else:
        gb_spec = pl.BlockSpec((rc, 2), lambda i: (i, 0))
        kernel = _affine_kernel_tiled

    y2 = pl.pallas_call(
        kernel,
        out_shape=jax.ShapeDtypeStruct((R, S), x.dtype),
        grid=(grid_r,),
        in_specs=[gb_spec, row_spec],
        out_specs=row_spec,
        compiler_params=pltpu.CompilerParams(
            dimension_semantics=("parallel",),
            # ~4 MiB x tiles -> <= ~16 MiB double-buffered in+out, plus <= 2 MiB
            # resident gamma/beta: fits with headroom on v7x (64 MiB physical)
            # and overrides v5e's 16 MiB default scoped limit.
            vmem_limit_bytes=32 * 1024 * 1024,
        ),
    )(gb, x2)

    return y2.reshape(N, C, H, W)


def affine_skip_part_ref(x, gamma, beta, skip1, skip2):
    """Pure-JAX reference matching the PyTorch forward exactly.
    (This is also the form to fuse into the backbone graph in practice.)"""
    C = x.shape[1]
    gamma = gamma.reshape(1, C, 1, 1)
    gamma = gamma + skip1.reshape(1, C, 1, 1) * gamma
    beta = beta.reshape(1, C, 1, 1)
    beta = beta + skip2.reshape(1, C, 1, 1) * beta
    return gamma * x + beta


if __name__ == "__main__":
    N, C, H, W = 2, 4, 16, 16

    key = jax.random.PRNGKey(0)
    kx, kg, kb = jax.random.split(key, 3)

    x = jax.random.normal(kx, (N, C, H, W), dtype=jnp.float32)
    # affine_part parameters (deterministic, synthetic): shape (1, C, 1, 1)
    gamma = jax.random.normal(kg, (1, C, 1, 1), dtype=jnp.float32)
    beta = jax.random.normal(kb, (1, C, 1, 1), dtype=jnp.float32)
    # skip1 / skip2 initialized to ones, like nn.Parameter(torch.ones(...))
    skip1 = jnp.ones((1, C, 1, 1), dtype=jnp.float32)
    skip2 = jnp.ones((1, C, 1, 1), dtype=jnp.float32)

    y = affine_skip_part(x, gamma, beta, skip1, skip2)
    y = jax.block_until_ready(y)

    y_ref = affine_skip_part_ref(x, gamma, beta, skip1, skip2)
    assert y.shape == (N, C, H, W)
    assert jnp.allclose(y, y_ref, atol=1e-5, rtol=1e-5)

    print("KERNEL_OK")
</pallas_src>

<mosaic_0001>
module attributes {stable_mosaic.version = 11 : i64} {
  func.func @_affine_kernel_resident(%arg0: i32, %arg1: memref<8x2xf32, #tpu.memory_space<vmem>>, %arg2: memref<8x256xf32, #tpu.memory_space<vmem>>, %arg3: memref<8x256xf32, #tpu.memory_space<vmem>>) attributes {dimension_semantics = [#tpu.dimension_semantics<parallel>], iteration_bounds = array<i64: 1>, scalar_prefetch = 0 : i64, scratch_operands = 0 : i64, tpu.core_type = #tpu.core_type<tc>, window_params = [{pipeline_mode = #tpu.pipeline_mode<synchronous>, transform_indices = @transform_0, window_bounds = array<i64: 8, 2>}, {transform_indices = @transform_1, window_bounds = array<i64: 8, 256>}, {transform_indices = @transform_2, window_bounds = array<i64: 8, 256>}]} {
    %c8_i32 = arith.constant 8 : i32
    %0 = arith.muli %arg0, %c8_i32 : i32
    %1 = tpu.assume_multiple %0, 8 : i32
    %2 = arith.index_cast %1 : i32 to index
    %c0 = arith.constant 0 : index
    %3 = vector.load %arg1[%2, %c0] : memref<8x2xf32, #tpu.memory_space<vmem>>, vector<8x2xf32>
    %4 = vector.extract_strided_slice %3 {offsets = [0, 0], sizes = [8, 1], strides = [1, 1]} : vector<8x2xf32> to vector<8x1xf32>
    %5 = vector.extract_strided_slice %3 {offsets = [0, 1], sizes = [8, 1], strides = [1, 1]} : vector<8x2xf32> to vector<8x1xf32>
    %c0_0 = arith.constant 0 : index
    %c0_1 = arith.constant 0 : index
    %6 = vector.load %arg2[%c0_0, %c0_1] : memref<8x256xf32, #tpu.memory_space<vmem>>, vector<8x256xf32>
    %7 = vector.broadcast %4 : vector<8x1xf32> to vector<8x256xf32>
    %8 = arith.mulf %7, %6 : vector<8x256xf32>
    %9 = vector.broadcast %5 : vector<8x1xf32> to vector<8x256xf32>
    %10 = arith.addf %8, %9 : vector<8x256xf32>
    %c0_2 = arith.constant 0 : index
    %c0_3 = arith.constant 0 : index
    %11 = vector.load %arg3[%c0_2, %c0_3] : memref<8x256xf32, #tpu.memory_space<vmem>>, vector<8x256xf32>
    tpu.vector_store %arg3[%c0_2, %c0_3], %10 {strides = array<i32>} : memref<8x256xf32, #tpu.memory_space<vmem>>, vector<8x256xf32>,
    return
  }
  func.func @transform_0(%arg0: i32) -> (i32, i32) {
    %c0_i32 = arith.constant 0 : i32
    %c0_i32_0 = arith.constant 0 : i32
    %c0_i32_1 = arith.constant 0 : i32
    return %c0_i32, %c0_i32_0 : i32, i32
  }
  func.func @transform_1(%arg0: i32) -> (i32, i32) {
    %c0_i32 = arith.constant 0 : i32
    %c0_i32_0 = arith.constant 0 : i32
    return %arg0, %c0_i32 : i32, i32
  }
  func.func @transform_2(%arg0: i32) -> (i32, i32) {
    %c0_i32 = arith.constant 0 : i32
    %c0_i32_0 = arith.constant 0 : i32
    return %arg0, %c0_i32 : i32, i32
  }
}

</mosaic_0001>

<bundles_post_ra>
// kernel: tpu_custom_call.1
= control target key start
LH: loop header
LB: loop body
LE: loop exit
PB: predicated region body
PF: predicated region fallthrough
CT: control target
= control target key end

     0   :  { %7 = vsyncpa [#allocation3], 0  ;;  %s149_s0 = inlined_call_operand.vmem [shape: f32[8,2], index: 0, kind: input, shape index: {}]   ;;  %s150_s1 = inlined_call_operand.hbm [shape: f32[8,256], index: 1, kind: input, shape index: {}]   ;;  %s151_s2 = inlined_call_operand.hbm [shape: f32[8,256], index: 2, kind: output, shape index: {}]  }
   0x1   :  { %8 = vsyncpa [#allocation4], 0  ;;  %s16_s11 = sshll.u32 %s150_s1, 4  ;;  %s121_s12 = smov [#allocation2]   ;;  %s17_s11 = int_to_ptr.hbm [resolvable:$true] %s16_s11 }
   0x2   :  { %s18_s13 = sshll.u32 %s121_s12, 4  ;;  %s19_s13 = int_to_ptr.vmem [resolvable:$true] %s18_s13 }
   0x3   :  { %21 = dma.hbm_to_vmem [thread:$0]  %s17_s11, 256, %s19_s13, [#allocation3]  }
   0x4   :  { %117 = dma.done.wait [#allocation3], 256  }
   0x5   :  { %118 = vsyncadd [#allocation3], 4294967040  ;;  %v122_v0 = vmov 0   ;;  %v28_v1 = vld [vmem:[%s149_s0] sm:$0xff]  ;;  %v123_v2 = vmov 1   ;;  %v30_v5 = vld [vmem:[#allocation2 + $0x8] sm:$0xff] }
   0x6   :  { %67 = vset.pattern.permute.xlu0 %v122_v0  ;;  %v29_v4 = vld [vmem:[#allocation2] sm:$0xff]  ;;  %s124_s1 = smov [#allocation5]   ;;  %s53_s19 = sshll.u32 %s151_s2, 4  ;;  %s54_s19 = int_to_ptr.hbm [resolvable:$true] %s53_s19 }
   0x7   :  { %33 = vperm.xlu0 %67, %v28_v1   ;;  %s51_s16 = sshll.u32 %s124_s1, 4  ;;  %s52_s16 = int_to_ptr.vmem [resolvable:$true] %s51_s16 }
   0xf   :  { %68 = vset.pattern.permute.xlu0 %v123_v2 }
  0x10   :  { %39 = vperm.xlu0 %68, %v28_v1  }
  0x79   :  { %v34_v3 = vpop.permute.xlu0 %33 }
  0x7a   :  { %v36_v6 = vmul.f32 %v34_v3, %v29_v4  ;;  %v37_v7 = vmul.f32 %v34_v3, %v30_v5 }
  0x82   :  { %v40_v8 = vpop.permute.xlu0 %39 }
  0x83   :  { %v42_v9 = vadd.f32 %v40_v8, %v36_v6  ;;  %v43_v10 = vadd.f32 %v40_v8, %v37_v7 }
  0x85   :  { %44 = vst [vmem:[#allocation5] sm:$0xff] %v42_v9 }
  0x86   :  { %45 = vst [vmem:[#allocation5 + $0x8] sm:$0xff] %v43_v10 }
  0x87   :  { %56 = dma.vmem_to_hbm [thread:$0]  %s52_s16, 256, %s54_s19, [#allocation4]  }
  0x88   :  { %119 = dma.done.wait [#allocation4], 256  }
  0x89   :  { %120 = vsyncadd [#allocation4], 4294967040 }
  0x8a   :  { %61 = vsyncpa [#allocation3], 1 }
  0x8b   :  { %62 = vsyncpa [#allocation4], 1 }

</bundles_post_ra>
